<compile_context>
chip_gen: v6e
topology: v6e:2x2x1
jax: 0.10.0
libtpu: 0.0.40
codegen_flags: <defaults>
</compile_context>

<pallas_src>
import jax
import jax.numpy as jnp
from jax import lax
from jax.experimental import pallas as pl
from jax.experimental.pallas import tpu as pltpu


def _make_mlp_kernel(n_linear):
    """Fused MLP kernel for a fixed (static) number of linear layers.

    Internal activations are kept transposed: h has shape (features, bm) with
    the batch tile on the 128-wide lane axis (features are tiny: 8/16/32).
    """

    def kernel(*refs):
        x_ref = refs[0]            # (bm, in_dim)  f32, natural layout
        o_ref = refs[-1]           # (bm, out_dim) f32, natural layout
        wb = refs[1:-1]            # interleaved (w0, b0, w1, b1, ...)
                                   # w: (out, in) bf16, b: (out, 1) f32

        # Layer 0: fold the (batch, in) -> (in, batch) flip into the MXU by
        # contracting BOTH operands over their feature axis ("q @ k.T" form):
        #   h[j, n] = sum_k W0[j, k] * x[n, k]
        x_bf = x_ref[...].astype(jnp.bfloat16)
        h = lax.dot_general(wb[0][...], x_bf, (((1,), (1,)), ((), ())),
                            preferred_element_type=jnp.float32)    # (hid, bm)
        h = jnp.tanh(h + wb[1][...])                                # f32 VPU/EUP

        # Hidden layers: standard W @ h (bf16 operands, f32 accumulate).
        for li in range(1, n_linear - 1):
            h = lax.dot_general(wb[2 * li][...], h.astype(jnp.bfloat16),
                                (((1,), (0,)), ((), ())),
                                preferred_element_type=jnp.float32)
            h = jnp.tanh(h + wb[2 * li + 1][...])

        # Last layer (no activation): compute in transposed layout, then flip
        # the small (out_dim, bm) result on the XLU so the HBM store is in the
        # module's natural (batch, out_dim) layout -- no wrapper-side .T.
        out_t = lax.dot_general(wb[2 * (n_linear - 1)][...],
                                h.astype(jnp.bfloat16),
                                (((1,), (0,)), ((), ())),
                                preferred_element_type=jnp.float32)  # (out, bm)
        out_t = out_t + wb[2 * (n_linear - 1) + 1][...]
        o_ref[...] = jnp.transpose(out_t).astype(o_ref.dtype)        # (bm, out)

    return kernel


def dynamics_model_forward(x, params, *, block_b=2048, single_step_rows=4096):
    """Fused forward pass of DynamicsModel.

    x:      (batch, input_shape) float32
    params: list of (W, b) in PyTorch layout: W (out, in), b (out,)
    returns (batch, output_shape) float32
    """
    batch, in_dim = x.shape
    n_linear = len(params)
    out_dim = params[-1][0].shape[0]

    # One-time parameter prep (tiny tensors): bf16 MXU operands, f32 biases
    # reshaped to (out, 1) so they broadcast along the lane (batch) axis.
    flat_wb = []
    for w, b in params:
        flat_wb.append(w.astype(jnp.bfloat16))
        flat_wb.append(b.reshape(-1, 1).astype(jnp.float32))

    # ---- batch tiling ------------------------------------------------------
    # Lane axis of the internal activations = batch, so keep it a multiple of
    # 128 (lane-dense vregs).  Small/medium batches run in ONE grid step (the
    # whole problem is a few MB of VMEM); large batches use ~block_b-row tiles
    # with an even number of steps so v7x megacore splits the work evenly.
    padded128 = pl.cdiv(batch, 128) * 128
    if padded128 <= single_step_rows:
        n_blk = 1
        bm = padded128
    else:
        n_blk = pl.cdiv(batch, block_b)
        if n_blk % 2:                 # v7x: even 'parallel' step count for 2 TCs
            n_blk += 1
        bm = pl.cdiv(pl.cdiv(batch, n_blk), 128) * 128
    padded = n_blk * bm
    xp = x if padded == batch else jnp.pad(x, ((0, padded - batch), (0, 0)))

    in_specs = [pl.BlockSpec((bm, in_dim), lambda i: (i, 0))]
    for arr in flat_wb:
        # Loop-invariant operands: constant block index -> fetched once,
        # no per-step re-DMA.
        in_specs.append(pl.BlockSpec(arr.shape, lambda i: (0, 0)))
    out_spec = pl.BlockSpec((bm, out_dim), lambda i: (i, 0))

    out = pl.pallas_call(
        _make_mlp_kernel(n_linear),
        out_shape=jax.ShapeDtypeStruct((padded, out_dim), jnp.float32),
        grid_spec=pl.GridSpec(grid=(n_blk,), in_specs=in_specs,
                              out_specs=out_spec),
        compiler_params=pltpu.CompilerParams(
            dimension_semantics=("parallel",)),
    )(xp, *flat_wb)

    # Drop batch padding (if any); already in natural (batch, out_dim) layout.
    return out if padded == batch else out[:batch]


def init_params(key, input_shape, output_shape, hid_shape, hid_num):
    """PyTorch nn.Linear-style init: U(-1/sqrt(fan_in), 1/sqrt(fan_in)).

    Weights in PyTorch layout (out_features, in_features); biases (out_features,).
    """
    dims = [input_shape] + [hid_shape] * (hid_num + 1) + [output_shape]
    params = []
    for i in range(len(dims) - 1):
        fan_in, fan_out = dims[i], dims[i + 1]
        key, kw, kb = jax.random.split(key, 3)
        bound = 1.0 / float(fan_in) ** 0.5
        w = jax.random.uniform(kw, (fan_out, fan_in), jnp.float32, -bound, bound)
        b = jax.random.uniform(kb, (fan_out,), jnp.float32, -bound, bound)
        params.append((w, b))
    return params


def reference_forward(x, params):
    """Pure-JAX f32 reference matching the PyTorch module semantics."""
    h = x
    n = len(params)
    for li, (w, b) in enumerate(params):
        h = h @ w.T + b
        if li < n - 1:
            h = jnp.tanh(h)
    return h


if __name__ == "__main__":
    # Module hyperparameters (small, consistent with the forward pass).
    input_shape = 16
    output_shape = 8
    hid_shape = 32
    hid_num = 2          # -> 4 linear layers total
    batch = 64

    key = jax.random.PRNGKey(0)
    key, kx = jax.random.split(key)
    x = jax.random.normal(kx, (batch, input_shape), jnp.float32)
    params = init_params(key, input_shape, output_shape, hid_shape, hid_num)

    out = jax.block_until_ready(dynamics_model_forward(x, params))
    ref = reference_forward(x, params)

    assert out.shape == (batch, output_shape)
    # bf16 MXU operands (f32 accumulate / f32 element-wise) -> loosened tolerance.
    assert jnp.allclose(out, ref, atol=5e-2, rtol=5e-2), "mismatch vs JAX reference"

    print("KERNEL_OK")
</pallas_src>

<mosaic_0001>
module attributes {stable_mosaic.version = 11 : i64} {
  func.func @kernel(%arg0: i32, %arg1: memref<128x16xf32, #tpu.memory_space<vmem>>, %arg2: memref<32x16xbf16, #tpu.memory_space<vmem>>, %arg3: memref<32x1xf32, #tpu.memory_space<vmem>>, %arg4: memref<32x32xbf16, #tpu.memory_space<vmem>>, %arg5: memref<32x1xf32, #tpu.memory_space<vmem>>, %arg6: memref<32x32xbf16, #tpu.memory_space<vmem>>, %arg7: memref<32x1xf32, #tpu.memory_space<vmem>>, %arg8: memref<8x32xbf16, #tpu.memory_space<vmem>>, %arg9: memref<8x1xf32, #tpu.memory_space<vmem>>, %arg10: memref<128x8xf32, #tpu.memory_space<vmem>>) attributes {dimension_semantics = [#tpu.dimension_semantics<parallel>], iteration_bounds = array<i64: 1>, scalar_prefetch = 0 : i64, scratch_operands = 0 : i64, tpu.core_type = #tpu.core_type<tc>, window_params = [{transform_indices = @transform_0, window_bounds = array<i64: 128, 16>}, {pipeline_mode = #tpu.pipeline_mode<synchronous>, transform_indices = @transform_1, window_bounds = array<i64: 32, 16>}, {pipeline_mode = #tpu.pipeline_mode<synchronous>, transform_indices = @transform_2, window_bounds = array<i64: 32, 1>}, {pipeline_mode = #tpu.pipeline_mode<synchronous>, transform_indices = @transform_3, window_bounds = array<i64: 32, 32>}, {pipeline_mode = #tpu.pipeline_mode<synchronous>, transform_indices = @transform_4, window_bounds = array<i64: 32, 1>}, {pipeline_mode = #tpu.pipeline_mode<synchronous>, transform_indices = @transform_5, window_bounds = array<i64: 32, 32>}, {pipeline_mode = #tpu.pipeline_mode<synchronous>, transform_indices = @transform_6, window_bounds = array<i64: 32, 1>}, {pipeline_mode = #tpu.pipeline_mode<synchronous>, transform_indices = @transform_7, window_bounds = array<i64: 8, 32>}, {pipeline_mode = #tpu.pipeline_mode<synchronous>, transform_indices = @transform_8, window_bounds = array<i64: 8, 1>}, {transform_indices = @transform_9, window_bounds = array<i64: 128, 8>}]} {
    %c0 = arith.constant 0 : index
    %c0_0 = arith.constant 0 : index
    %0 = vector.load %arg1[%c0, %c0_0] : memref<128x16xf32, #tpu.memory_space<vmem>>, vector<128x16xf32>
    %1 = arith.truncf %0 : vector<128x16xf32> to vector<128x16xbf16>
    %c0_1 = arith.constant 0 : index
    %c0_2 = arith.constant 0 : index
    %2 = vector.load %arg2[%c0_1, %c0_2] : memref<32x16xbf16, #tpu.memory_space<vmem>>, vector<32x16xbf16>
    %cst = arith.constant dense<0.000000e+00> : vector<32x128xf32>
    %3 = tpu.matmul %2, %1, %cst {dimension_numbers = #tpu.dot_dimension_numbers<[1], [1], [0], [0], [0, 0, 1, 0], [], []>} : vector<32x16xbf16>, vector<128x16xbf16>, vector<32x128xf32> -> vector<32x128xf32>
    %c0_3 = arith.constant 0 : index
    %c0_4 = arith.constant 0 : index
    %4 = vector.load %arg3[%c0_3, %c0_4] : memref<32x1xf32, #tpu.memory_space<vmem>>, vector<32x1xf32>
    %5 = vector.broadcast %4 : vector<32x1xf32> to vector<32x128xf32>
    %6 = arith.addf %3, %5 : vector<32x128xf32>
    %7 = math.tanh %6 : vector<32x128xf32>
    %c0_5 = arith.constant 0 : index
    %c0_6 = arith.constant 0 : index
    %8 = vector.load %arg4[%c0_5, %c0_6] : memref<32x32xbf16, #tpu.memory_space<vmem>>, vector<32x32xbf16>
    %9 = arith.truncf %7 : vector<32x128xf32> to vector<32x128xbf16>
    %cst_7 = arith.constant dense<0.000000e+00> : vector<32x128xf32>
    %10 = tpu.matmul %8, %9, %cst_7 {dimension_numbers = #tpu.dot_dimension_numbers<[1], [0], [0], [1], [0, 0, 1, 1], [], []>} : vector<32x32xbf16>, vector<32x128xbf16>, vector<32x128xf32> -> vector<32x128xf32>
    %c0_8 = arith.constant 0 : index
    %c0_9 = arith.constant 0 : index
    %11 = vector.load %arg5[%c0_8, %c0_9] : memref<32x1xf32, #tpu.memory_space<vmem>>, vector<32x1xf32>
    %12 = vector.broadcast %11 : vector<32x1xf32> to vector<32x128xf32>
    %13 = arith.addf %10, %12 : vector<32x128xf32>
    %14 = math.tanh %13 : vector<32x128xf32>
    %c0_10 = arith.constant 0 : index
    %c0_11 = arith.constant 0 : index
    %15 = vector.load %arg6[%c0_10, %c0_11] : memref<32x32xbf16, #tpu.memory_space<vmem>>, vector<32x32xbf16>
    %16 = arith.truncf %14 : vector<32x128xf32> to vector<32x128xbf16>
    %cst_12 = arith.constant dense<0.000000e+00> : vector<32x128xf32>
    %17 = tpu.matmul %15, %16, %cst_12 {dimension_numbers = #tpu.dot_dimension_numbers<[1], [0], [0], [1], [0, 0, 1, 1], [], []>} : vector<32x32xbf16>, vector<32x128xbf16>, vector<32x128xf32> -> vector<32x128xf32>
    %c0_13 = arith.constant 0 : index
    %c0_14 = arith.constant 0 : index
    %18 = vector.load %arg7[%c0_13, %c0_14] : memref<32x1xf32, #tpu.memory_space<vmem>>, vector<32x1xf32>
    %19 = vector.broadcast %18 : vector<32x1xf32> to vector<32x128xf32>
    %20 = arith.addf %17, %19 : vector<32x128xf32>
    %21 = math.tanh %20 : vector<32x128xf32>
    %c0_15 = arith.constant 0 : index
    %c0_16 = arith.constant 0 : index
    %22 = vector.load %arg8[%c0_15, %c0_16] : memref<8x32xbf16, #tpu.memory_space<vmem>>, vector<8x32xbf16>
    %23 = arith.truncf %21 : vector<32x128xf32> to vector<32x128xbf16>
    %cst_17 = arith.constant dense<0.000000e+00> : vector<8x128xf32>
    %24 = tpu.matmul %22, %23, %cst_17 {dimension_numbers = #tpu.dot_dimension_numbers<[1], [0], [0], [1], [0, 0, 1, 1], [], []>} : vector<8x32xbf16>, vector<32x128xbf16>, vector<8x128xf32> -> vector<8x128xf32>
    %c0_18 = arith.constant 0 : index
    %c0_19 = arith.constant 0 : index
    %25 = vector.load %arg9[%c0_18, %c0_19] : memref<8x1xf32, #tpu.memory_space<vmem>>, vector<8x1xf32>
    %26 = vector.broadcast %25 : vector<8x1xf32> to vector<8x128xf32>
    %27 = arith.addf %24, %26 : vector<8x128xf32>
    %28 = tpu.transpose %27, [1, 0] : vector<8x128xf32> -> vector<128x8xf32>
    %c0_20 = arith.constant 0 : index
    %c0_21 = arith.constant 0 : index
    %29 = vector.load %arg10[%c0_20, %c0_21] : memref<128x8xf32, #tpu.memory_space<vmem>>, vector<128x8xf32>
    tpu.vector_store %arg10[%c0_20, %c0_21], %28 {strides = array<i32>} : memref<128x8xf32, #tpu.memory_space<vmem>>, vector<128x8xf32>,
    return
  }
  func.func @transform_0(%arg0: i32) -> (i32, i32) {
    %c0_i32 = arith.constant 0 : i32
    %c0_i32_0 = arith.constant 0 : i32
    return %arg0, %c0_i32 : i32, i32
  }
  func.func @transform_1(%arg0: i32) -> (i32, i32) {
    %c0_i32 = arith.constant 0 : i32
    %c0_i32_0 = arith.constant 0 : i32
    %c0_i32_1 = arith.constant 0 : i32
    return %c0_i32, %c0_i32_0 : i32, i32
  }
  func.func @transform_2(%arg0: i32) -> (i32, i32) {
    %c0_i32 = arith.constant 0 : i32
    %c0_i32_0 = arith.constant 0 : i32
    %c0_i32_1 = arith.constant 0 : i32
    return %c0_i32, %c0_i32_0 : i32, i32
  }
  func.func @transform_3(%arg0: i32) -> (i32, i32) {
    %c0_i32 = arith.constant 0 : i32
    %c0_i32_0 = arith.constant 0 : i32
    %c0_i32_1 = arith.constant 0 : i32
    return %c0_i32, %c0_i32_0 : i32, i32
  }
  func.func @transform_4(%arg0: i32) -> (i32, i32) {
    %c0_i32 = arith.constant 0 : i32
    %c0_i32_0 = arith.constant 0 : i32
    %c0_i32_1 = arith.constant 0 : i32
    return %c0_i32, %c0_i32_0 : i32, i32
  }
  func.func @transform_5(%arg0: i32) -> (i32, i32) {
    %c0_i32 = arith.constant 0 : i32
    %c0_i32_0 = arith.constant 0 : i32
    %c0_i32_1 = arith.constant 0 : i32
    return %c0_i32, %c0_i32_0 : i32, i32
  }
  func.func @transform_6(%arg0: i32) -> (i32, i32) {
    %c0_i32 = arith.constant 0 : i32
    %c0_i32_0 = arith.constant 0 : i32
    %c0_i32_1 = arith.constant 0 : i32
    return %c0_i32, %c0_i32_0 : i32, i32
  }
  func.func @transform_7(%arg0: i32) -> (i32, i32) {
    %c0_i32 = arith.constant 0 : i32
    %c0_i32_0 = arith.constant 0 : i32
    %c0_i32_1 = arith.constant 0 : i32
    return %c0_i32, %c0_i32_0 : i32, i32
  }
  func.func @transform_8(%arg0: i32) -> (i32, i32) {
    %c0_i32 = arith.constant 0 : i32
    %c0_i32_0 = arith.constant 0 : i32
    %c0_i32_1 = arith.constant 0 : i32
    return %c0_i32, %c0_i32_0 : i32, i32
  }
  func.func @transform_9(%arg0: i32) -> (i32, i32) {
    %c0_i32 = arith.constant 0 : i32
    %c0_i32_0 = arith.constant 0 : i32
    return %arg0, %c0_i32 : i32, i32
  }
}

</mosaic_0001>

<bundles_post_ra>
// kernel: tpu_custom_call.1
= control target key start
LH: loop header
LB: loop body
LE: loop exit
PB: predicated region body
PF: predicated region fallthrough
CT: control target
= control target key end

     0   :  { %vm95_vm0 = vcmask 130048   ;;  %v604_v3 = vmov 0   ;;  %vm219_vm1 = vcmask 261120   ;;  %vm606_vm2 = vmmov 0   ;;  %s852_s0 = inlined_call_operand.vmem [shape: f32[128,16], index: 0, kind: input, shape index: {}]   ;;  %s853_s1 = inlined_call_operand.vmem [shape: bf16[32,16], index: 1, kind: input, shape index: {}]   ;;  %s854_s2 = inlined_call_operand.vmem [shape: f32[32,1], index: 2, kind: input, shape index: {}]   ;;  %s855_s4 = inlined_call_operand.vmem [shape: f32[32,1], index: 4, kind: input, shape index: {}]   ;;  %s856_s6 = inlined_call_operand.vmem [shape: f32[32,1], index: 6, kind: input, shape index: {}]   ;;  %s857_s8 = inlined_call_operand.vmem [shape: f32[8,1], index: 8, kind: input, shape index: {}]   ;;  %s858_s3 = inlined_call_operand.vmem [shape: bf16[32,32], index: 3, kind: input, shape index: {}]   ;;  %s859_s5 = inlined_call_operand.vmem [shape: bf16[32,32], index: 5, kind: input, shape index: {}]   ;;  %s860_s7 = inlined_call_operand.vmem [shape: bf16[8,32], index: 7, kind: input, shape index: {}]   ;;  %s861_s9 = inlined_call_operand.vmem [shape: f32[128,8], index: 9, kind: output, shape index: {}]  }
   0x1   :  { %v47_v0 = vld [vmem:[%s852_s0 + $0x70] sm:$0xff]  ;;  %v48_v1 = vld [vmem:[%s852_s0 + $0x78] sm:$0xff]  ;;  %v45_v2 = vld [vmem:[%s852_s0 + $0x60] sm:$0xff]  ;;  %572 = vset.pattern.permute.xlu0 %v604_v3  ;;  %573 = vset.pattern.permute.xlu1 %v604_v3  ;;  %vm462_vm3 = vcmask 64512  }
   0x2   :  { %v56_v4 = vpack.c.bf16 %v48_v1, %v47_v0  ;;  %v46_v5 = vld [vmem:[%s852_s0 + $0x68] sm:$0xff]  ;;  %v43_v8 = vld [vmem:[%s852_s0 + $0x50] sm:$0xff]  ;;  %v44_v9 = vld [vmem:[%s852_s0 + $0x58] sm:$0xff] }
   0x3   :  { %v55_v6 = vpack.c.bf16 %v46_v5, %v45_v2  ;;  %v574_v10 = vld [vmem:[%s853_s1] sm:$0xff]   ;;  %v63_v11 = vld [vmem:[%s854_s2 + $0x10] sm:$0xff]  ;;  %v54_v14 = vpack.c.bf16 %v44_v9, %v43_v8  ;;  %v64_v15 = vld [vmem:[%s854_s2 + $0x18] sm:$0xff] }
   0x4   :  { %561 = vmatprep.subr.msk.bf16.mxu0 %vm95_vm0, %v56_v4  ;;  %v124_v7 = vsel %vm95_vm0, %v56_v4, 0  ;;  %533 = vmatprep.mubr.msk.bf16.mxu0 %vm95_vm0, %v574_v10  ;;  %v61_v12 = vld [vmem:[%s854_s2] sm:$0xff]  ;;  %v62_v16 = vld [vmem:[%s854_s2 + $0x8] sm:$0xff]  ;;  %v187_v17 = vld [vmem:[%s855_s4 + $0x10] sm:$0xff] }
   0x5   :  { %518 = vmatpush3.bf16.xpose.msra.mxu0 %v124_v7  ;;  %77 = vperm.xlu0 %572, %v63_v11   ;;  %v121_v13 = vsel %vm95_vm0, %v55_v6, 0  ;;  %v41_v18 = vld [vmem:[%s852_s0 + $0x40] sm:$0xff]  ;;  %v42_v19 = vld [vmem:[%s852_s0 + $0x48] sm:$0xff]  ;;  %v188_v20 = vld [vmem:[%s855_s4 + $0x18] sm:$0xff]  ;;  %v118_v21 = vsel %vm95_vm0, %v54_v14, 0 }
   0x6   :  { %562 = vmatprep.subr.msk.bf16.mxu0 %vm95_vm0, %v55_v6  ;;  %67 = vperm.xlu1 %573, %v61_v12   ;;  %v53_v22 = vpack.c.bf16 %v42_v19, %v41_v18  ;;  %v185_v23 = vld [vmem:[%s855_s4] sm:$0xff]  ;;  %v186_v24 = vld [vmem:[%s855_s4 + $0x8] sm:$0xff]  ;;  %v287_v25 = vld [vmem:[%s856_s6 + $0x10] sm:$0xff] }
   0x7   :  { %v39_v26 = vld [vmem:[%s852_s0 + $0x30] sm:$0xff]  ;;  %v40_v27 = vld [vmem:[%s852_s0 + $0x38] sm:$0xff]  ;;  %v285_v31 = vld [vmem:[%s856_s6] sm:$0xff] }
   0x8   :  { %v288_v28 = vld [vmem:[%s856_s6 + $0x18] sm:$0xff]  ;;  %v115_v29 = vsel %vm95_vm0, %v53_v22, 0  ;;  %v52_v30 = vpack.c.bf16 %v40_v27, %v39_v26  ;;  %v286_v32 = vld [vmem:[%s856_s6 + $0x8] sm:$0xff]  ;;  %v381_v33 = vld [vmem:[%s857_s8] sm:$0xff] }
   0x9   :  { %82 = vperm.xlu0 %572, %v64_v15   ;;  %v37_v34 = vld [vmem:[%s852_s0 + $0x20] sm:$0xff]  ;;  %v38_v35 = vld [vmem:[%s852_s0 + $0x28] sm:$0xff]  ;;  %v35_v38 = vld [vmem:[%s852_s0 + $0x10] sm:$0xff] }
   0xa   :  { %72 = vperm.xlu1 %573, %v62_v16   ;;  %v112_v36 = vsel %vm95_vm0, %v52_v30, 0  ;;  %v51_v37 = vpack.c.bf16 %v38_v35, %v37_v34  ;;  %v36_v39 = vld [vmem:[%s852_s0 + $0x18] sm:$0xff]  ;;  %v33_v42 = vld [vmem:[%s852_s0] sm:$0xff]  ;;  %v34_v43 = vld [vmem:[%s852_s0 + $0x8] sm:$0xff] }
   0xb   :  { %v50_v41 = vpack.c.bf16 %v36_v39, %v35_v38  ;;  %v49_v45 = vpack.c.bf16 %v34_v43, %v33_v42  ;;  %v575_v47 = vld [vmem:[%s853_s1 + $0x8] sm:$0xff]   ;;  %v576_v48 = vld [vmem:[%s858_s3] sm:$0xff]  }
   0xc   :  { %v109_v40 = vsel %vm95_vm0, %v51_v37, 0  ;;  %541 = vmatprep.mubr.msk.bf16.mxu1 %vm219_vm1, %v576_v48  ;;  %v577_v3 = vld [vmem:[%s858_s3 + $0x8] sm:$0xff]   ;;  %v578_v4 = vld [vmem:[%s859_s5] sm:$0xff]  }
   0xd   :  { %520 = vmatpush3.bf16.xpose.msra.mxu0 %v121_v13  ;;  %201 = vperm.xlu0 %572, %v187_v17   ;;  %v106_v44 = vsel %vm95_vm0, %v50_v41, 0  ;;  %v103_v46 = vsel %vm95_vm0, %v49_v45, 0  ;;  %v378_v43 = vld [vmem:[%s860_s7] sm:$0xf] }
   0xe   :  { %563 = vmatprep.subr.msk.bf16.mxu0 %vm95_vm0, %v54_v14  ;;  %206 = vperm.xlu1 %573, %v188_v20  }
  0x11   :  { %191 = vperm.xlu0 %572, %v185_v23   ;;  %v579_v23 = vld [vmem:[%s859_s5 + $0x8] sm:$0xff]  }
  0x12   :  { %196 = vperm.xlu1 %573, %v186_v24   ;;  %v605_v24 = vmov 0.0  }
  0x15   :  { %522 = vmatpush3.bf16.xpose.msra.mxu0 %v118_v21  ;;  %301 = vperm.xlu0 %572, %v287_v25  }
  0x16   :  { %564 = vmatprep.subr.msk.bf16.mxu0 %vm95_vm0, %v53_v22  ;;  %306 = vperm.xlu1 %573, %v288_v28  }
  0x19   :  { %291 = vperm.xlu0 %572, %v285_v31  }
  0x1a   :  { %296 = vperm.xlu1 %573, %v286_v32  }
  0x1d   :  { %524 = vmatpush3.bf16.xpose.msra.mxu0 %v115_v29  ;;  %384 = vperm.xlu0 %572, %v381_v33  }
  0x1e   :  { %565 = vmatprep.subr.msk.bf16.mxu0 %vm95_vm0, %v52_v30 }
  0x25   :  { %526 = vmatpush3.bf16.xpose.msra.mxu0 %v112_v36 }
  0x26   :  { %566 = vmatprep.subr.msk.bf16.mxu0 %vm95_vm0, %v51_v37 }
  0x2d   :  { %528 = vmatpush3.bf16.xpose.msra.mxu0 %v109_v40 }
  0x2e   :  { %567 = vmatprep.subr.msk.bf16.mxu0 %vm95_vm0, %v50_v41 }
  0x35   :  { %530 = vmatpush3.bf16.xpose.msra.mxu0 %v106_v44 }
  0x36   :  { %568 = vmatprep.subr.msk.bf16.mxu0 %vm95_vm0, %v49_v45 }
  0x3d   :  { %532 = vmatpush3.bf16.xpose.msra.mxu0 %v103_v46 }
  0x44   :  { %534 = vmatmul.mubr.msk.bf16.vlgmr.msra.gmra.mxu0 %vm95_vm0, %v575_v47 }
  0x80   :  { %v78_v49 = vpop.permute.xlu0 %77 }
  0x81   :  { %v68_v50 = vpop.permute.xlu1 %67 }
  0x84   :  { %v83_v54 = vpop.permute.xlu0 %82 }
  0x85   :  { %v73_v58 = vpop.permute.xlu1 %72 }
  0x88   :  { %v202_v5 = vpop.permute.xlu0 %201 }
  0x89   :  { %v207_v6 = vpop.permute.xlu1 %206 }
  0x8c   :  { %v192_v10 = vpop.permute.xlu0 %191 }
  0x8d   :  { %v197_v14 = vpop.permute.xlu1 %196 }
  0x90   :  { %v302_v25 = vpop.permute.xlu0 %301 }
  0x91   :  { %v307_v26 = vpop.permute.xlu1 %306 }
  0x94   :  { %v292_v31 = vpop.permute.xlu0 %291 }
  0x95   :  { %v297_v33 = vpop.permute.xlu1 %296 }
  0x98   :  { %v385_v44 = vpop.permute.xlu0 %384 }
 0x104   :  { %v535_v51 = vpop.f32.mrf.mxu0 }
 0x105   :  { %v169_v52 = vadd.f32 %v535_v51, %v78_v49 }
 0x106   :  { %v160_v53 = vpop.f32.mrf.mxu0 }
 0x107   :  { %v161_v55 = vadd.f32 %v160_v53, %v68_v50  ;;  %580 = vtanh.f32 %v169_v52 }
 0x108   :  { %v536_v56 = vpop.f32.mrf.mxu0 }
 0x109   :  { %v172_v57 = vadd.f32 %v536_v56, %v83_v54 }
 0x10a   :  { %v163_v59 = vpop.f32.mrf.mxu0 }
 0x10b   :  { %582 = vtanh.f32 %v172_v57  ;;  %v164_v60 = vadd.f32 %v163_v59, %v73_v58 }
 0x10c   :  { %584 = vtanh.f32 %v161_v55 }
 0x10d   :  { %586 = vtanh.f32 %v164_v60 }
 0x114   :  { %v581_v61 = vpop.eup %580 }
 0x118   :  { %v583_v62 = vpop.eup %582 }
 0x119   :  { %v585_v63 = vpop.eup %584  ;;  %v184_v0 = vpack.c.bf16 %v583_v62, %v581_v61 }
 0x11a   :  { %v587_v1 = vpop.eup %586 }
 0x11b   :  { %537 = vmatprep.subr.bf16.mxu1 %v184_v0  ;;  %v183_v2 = vpack.c.bf16 %v587_v1, %v585_v63 }
 0x11c   :  { %538 = vmatpush3.bf16.msra.mxu1 %v184_v0 }
 0x11d   :  { %539 = vmatprep.subr.bf16.mxu1 %v183_v2 }
 0x120   :  { %540 = vmatpush3.bf16.msra.mxu1 %v183_v2 }
 0x123   :  { %542 = vmatmul.mubr.msk.bf16.vlgmr.msra.gmra.mxu1 %vm219_vm1, %v577_v3 }
 0x124   :  { %549 = vmatprep.mubr.msk.bf16.mxu1 %vm219_vm1, %v578_v4 }
 0x1e3   :  { %v543_v7 = vpop.f32.mrf.mxu1 }
 0x1e4   :  { %v269_v8 = vadd.f32 %v543_v7, %v202_v5 }
 0x1e5   :  { %v260_v9 = vpop.f32.mrf.mxu1 }
 0x1e6   :  { %v261_v11 = vadd.f32 %v260_v9, %v192_v10  ;;  %588 = vtanh.f32 %v269_v8 }
 0x1e7   :  { %v544_v12 = vpop.f32.mrf.mxu1 }
 0x1e8   :  { %v272_v13 = vadd.f32 %v544_v12, %v207_v6 }
 0x1e9   :  { %v263_v15 = vpop.f32.mrf.mxu1 }
 0x1ea   :  { %590 = vtanh.f32 %v272_v13  ;;  %v264_v16 = vadd.f32 %v263_v15, %v197_v14 }
 0x1eb   :  { %592 = vtanh.f32 %v261_v11 }
 0x1ec   :  { %594 = vtanh.f32 %v264_v16 }
 0x1f3   :  { %v589_v17 = vpop.eup %588 }
 0x1f7   :  { %v591_v18 = vpop.eup %590 }
 0x1f8   :  { %v593_v19 = vpop.eup %592  ;;  %v284_v20 = vpack.c.bf16 %v591_v18, %v589_v17 }
 0x1f9   :  { %v595_v21 = vpop.eup %594 }
 0x1fa   :  { %545 = vmatprep.subr.bf16.mxu1 %v284_v20  ;;  %v283_v22 = vpack.c.bf16 %v595_v21, %v593_v19 }
 0x1fb   :  { %546 = vmatpush3.bf16.msra.mxu1 %v284_v20 }
 0x1fc   :  { %547 = vmatprep.subr.bf16.mxu1 %v283_v22 }
 0x1ff   :  { %548 = vmatpush3.bf16.msra.mxu1 %v283_v22 }
 0x200   :  { %553 = vmatprep.subr.bf16.mxu1 %v605_v24 }
 0x202   :  { %550 = vmatmul.mubr.msk.bf16.vlgmr.msra.gmra.mxu1 %vm219_vm1, %v579_v23 }
 0x203   :  { %557 = vmatprep.mubr.msk.bf16.mxu1 %vm606_vm2, %v605_v24 }
 0x2c2   :  { %v551_v27 = vpop.f32.mrf.mxu1 }
 0x2c3   :  { %v368_v28 = vadd.f32 %v551_v27, %v302_v25 }
 0x2c4   :  { %v359_v29 = vpop.f32.mrf.mxu1 }
 0x2c5   :  { %596 = vtanh.f32 %v368_v28  ;;  %v360_v35 = vadd.f32 %v359_v29, %v292_v31 }
 0x2c6   :  { %v552_v30 = vpop.f32.mrf.mxu1 }
 0x2c7   :  { %v371_v32 = vadd.f32 %v552_v30, %v307_v26 }
 0x2c8   :  { %v362_v34 = vpop.f32.mrf.mxu1 }
 0x2c9   :  { %598 = vtanh.f32 %v371_v32  ;;  %v363_v36 = vadd.f32 %v362_v34, %v297_v33 }
 0x2cb   :  { %600 = vtanh.f32 %v363_v36 }
 0x2cc   :  { %602 = vtanh.f32 %v360_v35 }
 0x2d2   :  { %v597_v37 = vpop.eup %596 }
 0x2d6   :  { %v599_v38 = vpop.eup %598 }
 0x2d7   :  { %v380_v39 = vpack.c.bf16 %v599_v38, %v597_v37 }
 0x2d8   :  { %v601_v40 = vpop.eup %600 }
 0x2d9   :  { %554 = vmatpush3.bf16.msra.mxu1 %v380_v39  ;;  %v603_v41 = vpop.eup %602 }
 0x2da   :  { %555 = vmatprep.subr.bf16.mxu1 %v605_v24  ;;  %v379_v42 = vpack.c.bf16 %v601_v40, %v603_v41 }
 0x2dd   :  { %556 = vmatpush3.bf16.msra.mxu1 %v379_v42 }
 0x2e0   :  { %558 = vmatmul.mubr.msk.bf16.vlgmr.msra.gmra.mxu1 %vm219_vm1, %v378_v43 }
 0x3a0   :  { %v424_v45 = vpop.f32.mrf.mxu1 }
 0x3a1   :  { %v425_v46 = vadd.f32 %v424_v45, %v385_v44 }
 0x3a2   :  { %v559_v47 = vpop.f32.mrf.mxu1 }
 0x3a3   :  { %430 = vxpose.xlu1.b32.start.end [1/1] (short) %v425_v46, 128 }
 0x3a4   :  { %v427_v48 = vpop.f32.mrf.mxu1 }
 0x3a6   :  { %v560_v49 = vpop.f32.mrf.mxu1 }
 0x41f   :  { %v446_v50 = vpop.trf.xlu1 }
 0x420   :  { %463 = vst.msk [vmem:[%s861_s9] sm:$0xff] %vm462_vm3, %v446_v50 }
 0x423   :  { %v447_v51 = vpop.trf.xlu1 }
 0x424   :  { %464 = vst.msk [vmem:[%s861_s9 + $0x8] sm:$0xff] %vm462_vm3, %v447_v51 }
 0x427   :  { %v448_v52 = vpop.trf.xlu1 }
 0x428   :  { %465 = vst.msk [vmem:[%s861_s9 + $0x10] sm:$0xff] %vm462_vm3, %v448_v52 }
 0x42b   :  { %v449_v53 = vpop.trf.xlu1 }
 0x42c   :  { %466 = vst.msk [vmem:[%s861_s9 + $0x18] sm:$0xff] %vm462_vm3, %v449_v53 }
 0x42f   :  { %v450_v54 = vpop.trf.xlu1 }
 0x430   :  { %467 = vst.msk [vmem:[%s861_s9 + $0x20] sm:$0xff] %vm462_vm3, %v450_v54 }
 0x433   :  { %v451_v55 = vpop.trf.xlu1 }
 0x434   :  { %468 = vst.msk [vmem:[%s861_s9 + $0x28] sm:$0xff] %vm462_vm3, %v451_v55 }
 0x437   :  { %v452_v56 = vpop.trf.xlu1 }
 0x438   :  { %469 = vst.msk [vmem:[%s861_s9 + $0x30] sm:$0xff] %vm462_vm3, %v452_v56 }
 0x43b   :  { %v453_v57 = vpop.trf.xlu1 }
 0x43c   :  { %470 = vst.msk [vmem:[%s861_s9 + $0x38] sm:$0xff] %vm462_vm3, %v453_v57 }
 0x43f   :  { %v454_v58 = vpop.trf.xlu1 }
 0x440   :  { %471 = vst.msk [vmem:[%s861_s9 + $0x40] sm:$0xff] %vm462_vm3, %v454_v58 }
 0x443   :  { %v455_v59 = vpop.trf.xlu1 }
 0x444   :  { %472 = vst.msk [vmem:[%s861_s9 + $0x48] sm:$0xff] %vm462_vm3, %v455_v59 }
 0x447   :  { %v456_v60 = vpop.trf.xlu1 }
 0x448   :  { %473 = vst.msk [vmem:[%s861_s9 + $0x50] sm:$0xff] %vm462_vm3, %v456_v60 }
 0x44b   :  { %v457_v61 = vpop.trf.xlu1 }
 0x44c   :  { %474 = vst.msk [vmem:[%s861_s9 + $0x58] sm:$0xff] %vm462_vm3, %v457_v61 }
 0x44f   :  { %v458_v62 = vpop.trf.xlu1 }
 0x450   :  { %475 = vst.msk [vmem:[%s861_s9 + $0x60] sm:$0xff] %vm462_vm3, %v458_v62 }
 0x453   :  { %v459_v63 = vpop.trf.xlu1 }
 0x454   :  { %476 = vst.msk [vmem:[%s861_s9 + $0x68] sm:$0xff] %vm462_vm3, %v459_v63 }
 0x457   :  { %v460_v0 = vpop.trf.xlu1 }
 0x458   :  { %477 = vst.msk [vmem:[%s861_s9 + $0x70] sm:$0xff] %vm462_vm3, %v460_v0 }
 0x45b   :  { %v461_v1 = vpop.trf.xlu1 }
 0x45c   :  { %478 = vst.msk [vmem:[%s861_s9 + $0x78] sm:$0xff] %vm462_vm3, %v461_v1 }

</bundles_post_ra>
